<compile_context>
chip_gen: v7x
topology: tpu7x:2x2x1
jax: 0.10.0
libtpu: 0.0.40
codegen_flags: <defaults>
</compile_context>

<pallas_src>
from typing import NamedTuple

import jax
import jax.numpy as jnp
from jax.experimental import pallas as pl
from jax.experimental.pallas import tpu as pltpu


def _round_up(x, m):
    return ((x + m - 1) // m) * m


def _cdiv(a, b):
    return -(-a // b)


def _physical_vmem_budget():
    """~75% of physical VMEM (leave headroom for compiler scratch/semaphores)."""
    try:
        cap = int(pltpu.get_tpu_info().vmem_capacity_bytes)
    except Exception:
        cap = 64 << 20  # v7x worst case
    return (cap * 3) // 4


def _vmem_limit(need_bytes, budget):
    return int(min(max(2 * need_bytes + (2 << 20), 16 << 20), budget))


class HeadParams(NamedTuple):
    """Padded / pre-cast parameters. Prepare once, reuse every call."""
    w1: jax.Array    # [H_pad, H_pad], param_dtype
    b1: jax.Array    # [1, H_pad], f32
    w2: jax.Array    # [H_pad, L_pad], param_dtype
    b2: jax.Array    # [1, L_pad], f32
    hidden: int      # unpadded H
    labels: int      # unpadded L


def prepare_head_params(w1, b1, w2, b2, *, param_dtype=jnp.bfloat16):
    """Pad to lane-aligned shapes and cast weights to the storage dtype.

    Do this ONCE (e.g. at model load): padding/casting the weights inside the
    per-call path roughly doubles the effective weight HBM traffic of this
    bandwidth-bound kernel.
    """
    H, L = w2.shape
    assert w1.shape == (H, H) and b1.shape == (H,) and b2.shape == (L,)
    H_pad = _round_up(H, 128)
    L_pad = _round_up(L, 128)
    if H_pad != H:
        w1 = jnp.pad(w1, ((0, H_pad - H), (0, H_pad - H)))
        b1 = jnp.pad(b1, (0, H_pad - H))
    if H_pad != H or L_pad != L:
        w2 = jnp.pad(w2, ((0, H_pad - H), (0, L_pad - L)))
    if L_pad != L:
        b2 = jnp.pad(b2, (0, L_pad - L))
    return HeadParams(
        w1=w1.astype(param_dtype),
        b1=b1.reshape(1, H_pad).astype(jnp.float32),
        w2=w2.astype(param_dtype),
        b2=b2.reshape(1, L_pad).astype(jnp.float32),
        hidden=H, labels=L)


def _head_fused_kernel(x_ref, w1_ref, b1_ref, w2_ref, b2_ref, o_ref):
    """Fully fused head; grid = (batch_blocks, hidden_col_splits).

    x:  [Bt, Hp]    w1: [Hp, Hs]   b1: [1, Hs]
    w2: [Hs, Lp]    b2: [1, Lp]    o:  [1, Bt, Lp]  (f32, split-indexed)
    """
    h = jnp.tanh(
        jnp.dot(x_ref[...], w1_ref[...], preferred_element_type=jnp.float32)
        + b1_ref[...])
    out = jnp.dot(h.astype(w2_ref.dtype), w2_ref[...],
                  preferred_element_type=jnp.float32)
    # Add the out_proj bias exactly once (split 0 only).
    gate = (pl.program_id(1) == 0).astype(jnp.float32)
    o_ref[0] = (out + gate * b2_ref[...]).astype(o_ref.dtype)


def _head_ktiled_kernel(x_ref, w1_ref, b1_ref, w2_ref, b2_ref, o_ref, acc_ref):
    """Fallback when W1 does not fit VMEM; grid = (batch_blocks, k_blocks).

    x:  [Bt, TK]   w1: [TK, Hp]   b1: [1, Hp]
    w2: [Hp, Lp]   b2: [1, Lp]    o:  [Bt, Lp] f32   acc: [Bt, Hp] f32
    """
    k = pl.program_id(1)

    @pl.when(k == 0)
    def _():
        acc_ref[...] = jnp.zeros_like(acc_ref)

    acc_ref[...] += jnp.dot(x_ref[...], w1_ref[...],
                            preferred_element_type=jnp.float32)

    @pl.when(k == pl.num_programs(1) - 1)
    def _():
        h = jnp.tanh(acc_ref[...] + b1_ref[...])
        out = jnp.dot(h.astype(w2_ref.dtype), w2_ref[...],
                      preferred_element_type=jnp.float32) + b2_ref[...]
        o_ref[...] = out.astype(o_ref.dtype)


def wav2vec2_classification_head(features, params: HeadParams, *,
                                 b_tile_cap=256, hidden_splits=None,
                                 force_ktiled=False, k_tile=None):
    """features: [B, H] -> logits [B, num_labels] (f32).

    Dropout is identity at inference and therefore omitted.
    """
    B, H = features.shape
    assert H == params.hidden, (H, params.hidden)
    H_pad = params.w1.shape[0]
    L_pad = params.w2.shape[1]
    L = params.labels
    param_dtype = params.w1.dtype
    p_bytes = jnp.dtype(param_dtype).itemsize

    # Balanced batch tiling (at most one sublane of padding waste).
    B8 = _round_up(B, 8)
    n_b = _cdiv(B8, b_tile_cap)
    B_tile = _round_up(_cdiv(B8, n_b), 8)
    B_pad = B_tile * n_b

    # Cast activations once to the weight storage dtype; pad to the tile grid.
    x_p = features.astype(param_dtype)
    if (B_pad, H_pad) != x_p.shape:
        x_p = jnp.pad(x_p, ((0, B_pad - B), (0, H_pad - H)))

    budget = _physical_vmem_budget()

    # VMEM need of the resident-weight path (double-buffered tiles).
    resident_need = (2 * B_tile * H_pad * p_bytes       # x tiles
                     + 2 * H_pad * H_pad * p_bytes      # W1 (resident)
                     + 2 * H_pad * L_pad * p_bytes      # W2 (resident)
                     + 2 * (H_pad + L_pad) * 4          # biases
                     + 2 * B_tile * L_pad * 4)          # f32 output tiles
    use_ktiled = force_ktiled or (resident_need > budget - (2 << 20))

    if not use_ktiled:
        # -------- resident-weight path (the common case) --------
        if hidden_splits is None:
            # Give v7x's second TensorCore work when there is only one batch
            # block; a tiny extra step on single-TC chips.
            hidden_splits = 2 if (n_b == 1 and H_pad % 256 == 0) else 1
        n_s = max(1, int(hidden_splits))
        while n_s > 1 and H_pad % (n_s * 128) != 0:
            n_s -= 1
        Hs = H_pad // n_s

        out_p = pl.pallas_call(
            _head_fused_kernel,
            out_shape=jax.ShapeDtypeStruct((n_s, B_pad, L_pad), jnp.float32),
            grid_spec=pltpu.PrefetchScalarGridSpec(
                num_scalar_prefetch=0,
                grid=(n_b, n_s),
                in_specs=[
                    pl.BlockSpec((B_tile, H_pad), lambda b, s: (b, 0)),   # x
                    pl.BlockSpec((H_pad, Hs), lambda b, s: (0, s)),       # W1 cols
                    pl.BlockSpec((1, Hs), lambda b, s: (0, s)),           # b1
                    pl.BlockSpec((Hs, L_pad), lambda b, s: (s, 0)),       # W2 rows
                    pl.BlockSpec((1, L_pad), lambda b, s: (0, 0)),        # b2
                ],
                out_specs=pl.BlockSpec((1, B_tile, L_pad),
                                       lambda b, s: (s, b, 0)),
            ),
            compiler_params=pltpu.CompilerParams(
                dimension_semantics=("parallel", "parallel"),
                vmem_limit_bytes=_vmem_limit(resident_need, budget)),
        )(x_p, params.w1, params.b1, params.w2, params.b2)
        out2 = out_p[0] if n_s == 1 else jnp.sum(out_p, axis=0)
        return out2[:B, :L]

    # -------- K-tiled fallback (W1 does not fit VMEM) --------
    def ktiled_need(tk):
        return (2 * B_tile * tk * p_bytes
                + 2 * tk * H_pad * p_bytes
                + 2 * H_pad * L_pad * p_bytes
                + 2 * (H_pad + L_pad) * 4
                + B_tile * H_pad * 4
                + 2 * B_tile * L_pad * 4)

    if k_tile is not None:
        TK = int(k_tile)
        assert H_pad % TK == 0 and TK % 128 == 0
    else:
        TK = 128
        for cand in (H_pad, 4096, 2048, 1024, 512, 256, 128):
            if H_pad % cand == 0 and ktiled_need(cand) <= budget - (2 << 20):
                TK = cand
                break
    n_k = H_pad // TK

    out_p = pl.pallas_call(
        _head_ktiled_kernel,
        out_shape=jax.ShapeDtypeStruct((B_pad, L_pad), jnp.float32),
        grid_spec=pltpu.PrefetchScalarGridSpec(
            num_scalar_prefetch=0,
            grid=(n_b, n_k),
            in_specs=[
                pl.BlockSpec((B_tile, TK), lambda b, k: (b, k)),     # x
                pl.BlockSpec((TK, H_pad), lambda b, k: (k, 0)),      # W1
                pl.BlockSpec((1, H_pad), lambda b, k: (0, 0)),       # b1
                pl.BlockSpec((H_pad, L_pad), lambda b, k: (0, 0)),   # W2
                pl.BlockSpec((1, L_pad), lambda b, k: (0, 0)),       # b2
            ],
            out_specs=pl.BlockSpec((B_tile, L_pad), lambda b, k: (b, 0)),
            scratch_shapes=[pltpu.VMEM((B_tile, H_pad), jnp.float32)],
        ),
        compiler_params=pltpu.CompilerParams(
            dimension_semantics=("parallel", "arbitrary"),
            vmem_limit_bytes=_vmem_limit(ktiled_need(TK), budget)),
    )(x_p, params.w1, params.b1, params.w2, params.b2)
    return out_p[:B, :L]


def wav2vec2_classification_head_raw(features, w1, b1, w2, b2, *,
                                     param_dtype=jnp.bfloat16, **kwargs):
    """One-shot convenience (prepares params per call; prefer preparing once)."""
    return wav2vec2_classification_head(
        features,
        prepare_head_params(w1, b1, w2, b2, param_dtype=param_dtype),
        **kwargs)


if __name__ == "__main__":
    def ref_head(x, w1, b1, w2, b2):
        # Pure-JAX reference (dropout = identity in eval mode).
        return jnp.tanh(x @ w1 + b1) @ w2 + b2

    key = jax.random.PRNGKey(0)

    # ---- Config 1: spec's small shapes (batch=2, hidden=32, labels=4). ----
    B, H, L = 2, 32, 4
    k_x, k_w1, k_b1, k_w2, k_b2 = jax.random.split(key, 5)
    x = jax.random.normal(k_x, (B, H), dtype=jnp.float32)
    w1 = jax.random.normal(k_w1, (H, H), dtype=jnp.float32) * 0.05
    b1 = jax.random.normal(k_b1, (H,), dtype=jnp.float32) * 0.01
    w2 = jax.random.normal(k_w2, (H, L), dtype=jnp.float32) * 0.05
    b2 = jax.random.normal(k_b2, (L,), dtype=jnp.float32) * 0.01
    ref = ref_head(x, w1, b1, w2, b2)

    # f32 weight storage: exact.
    p_f32 = prepare_head_params(w1, b1, w2, b2, param_dtype=jnp.float32)
    out = jax.block_until_ready(wav2vec2_classification_head(x, p_f32))
    assert out.shape == (B, L) and out.dtype == jnp.float32
    assert jnp.allclose(out, ref, atol=1e-5, rtol=1e-5)

    # bf16 weight storage (the bandwidth-optimized default): loose tolerance.
    p_bf16 = prepare_head_params(w1, b1, w2, b2)
    out_bf16 = jax.block_until_ready(wav2vec2_classification_head(x, p_bf16))
    assert out_bf16.shape == (B, L)
    assert jnp.allclose(out_bf16, ref, atol=5e-2, rtol=5e-2)

    # Multiple batch tiles (resident W1 across batch blocks), small b_tile_cap.
    Bm = 20
    xm = jax.random.normal(jax.random.PRNGKey(1), (Bm, H), dtype=jnp.float32)
    refm = ref_head(xm, w1, b1, w2, b2)
    outm = jax.block_until_ready(
        wav2vec2_classification_head(xm, p_f32, b_tile_cap=8))
    assert outm.shape == (Bm, L)
    assert jnp.allclose(outm, refm, atol=1e-5, rtol=1e-5)

    # ---- Config 2: lane-aligned hidden (exercises the hidden-column split
    #      used for v7x, plus the K-tiled fallback). Still small. ----
    B2, H2, L2 = 4, 256, 3
    k2 = jax.random.PRNGKey(2)
    k_x, k_w1, k_b1, k_w2, k_b2 = jax.random.split(k2, 5)
    x2 = jax.random.normal(k_x, (B2, H2), dtype=jnp.float32)
    w1_2 = jax.random.normal(k_w1, (H2, H2), dtype=jnp.float32) * 0.03
    b1_2 = jax.random.normal(k_b1, (H2,), dtype=jnp.float32) * 0.01
    w2_2 = jax.random.normal(k_w2, (H2, L2), dtype=jnp.float32) * 0.03
    b2_2 = jax.random.normal(k_b2, (L2,), dtype=jnp.float32) * 0.01
    ref2 = ref_head(x2, w1_2, b1_2, w2_2, b2_2)

    p2_f32 = prepare_head_params(w1_2, b1_2, w2_2, b2_2,
                                 param_dtype=jnp.float32)
    p2_bf16 = prepare_head_params(w1_2, b1_2, w2_2, b2_2)

    # Resident path with hidden split (n_b == 1, H_pad % 256 == 0 -> n_s = 2).
    out2 = jax.block_until_ready(wav2vec2_classification_head(x2, p2_f32))
    assert out2.shape == (B2, L2)
    assert jnp.allclose(out2, ref2, atol=1e-4, rtol=1e-4)

    out2b = jax.block_until_ready(wav2vec2_classification_head(x2, p2_bf16))
    assert out2b.shape == (B2, L2)
    assert jnp.allclose(out2b, ref2, atol=5e-2, rtol=5e-2)

    # Forced K-tiled fallback with 2 reduction steps (accumulator exercised).
    out2k = jax.block_until_ready(
        wav2vec2_classification_head(x2, p2_f32, force_ktiled=True, k_tile=128))
    assert out2k.shape == (B2, L2)
    assert jnp.allclose(out2k, ref2, atol=1e-4, rtol=1e-4)

    print("KERNEL_OK")
</pallas_src>

<mosaic_0001>
module attributes {stable_mosaic.version = 11 : i64} {
  func.func @_head_fused_kernel(%arg0: i32, %arg1: i32, %arg2: memref<8x128xf32, #tpu.memory_space<vmem>>, %arg3: memref<128x128xf32, #tpu.memory_space<vmem>>, %arg4: memref<1x128xf32, #tpu.memory_space<vmem>>, %arg5: memref<128x128xf32, #tpu.memory_space<vmem>>, %arg6: memref<1x128xf32, #tpu.memory_space<vmem>>, %arg7: memref<1x8x128xf32, #tpu.memory_space<vmem>>) attributes {dimension_semantics = [#tpu.dimension_semantics<parallel>, #tpu.dimension_semantics<parallel>], iteration_bounds = array<i64: 1, 1>, scalar_prefetch = 0 : i64, scratch_operands = 0 : i64, tpu.core_type = #tpu.core_type<tc>, window_params = [{transform_indices = @transform_0, window_bounds = array<i64: 8, 128>}, {transform_indices = @transform_1, window_bounds = array<i64: 128, 128>}, {transform_indices = @transform_2, window_bounds = array<i64: 1, 128>}, {transform_indices = @transform_3, window_bounds = array<i64: 128, 128>}, {pipeline_mode = #tpu.pipeline_mode<synchronous>, transform_indices = @transform_4, window_bounds = array<i64: 1, 128>}, {transform_indices = @transform_5, window_bounds = array<i64: 1, 8, 128>}]} {
    %c0 = arith.constant 0 : index
    %c0_0 = arith.constant 0 : index
    %0 = vector.load %arg2[%c0, %c0_0] : memref<8x128xf32, #tpu.memory_space<vmem>>, vector<8x128xf32>
    %c0_1 = arith.constant 0 : index
    %c0_2 = arith.constant 0 : index
    %1 = vector.load %arg3[%c0_1, %c0_2] : memref<128x128xf32, #tpu.memory_space<vmem>>, vector<128x128xf32>
    %cst = arith.constant dense<0.000000e+00> : vector<8x128xf32>
    %2 = tpu.matmul %0, %1, %cst {dimension_numbers = #tpu.dot_dimension_numbers<[1], [0], [0], [1], [0, 0, 1, 1], [], []>} : vector<8x128xf32>, vector<128x128xf32>, vector<8x128xf32> -> vector<8x128xf32>
    %c0_3 = arith.constant 0 : index
    %c0_4 = arith.constant 0 : index
    %3 = vector.load %arg4[%c0_3, %c0_4] : memref<1x128xf32, #tpu.memory_space<vmem>>, vector<1x128xf32>
    %4 = vector.broadcast %3 : vector<1x128xf32> to vector<8x128xf32>
    %5 = arith.addf %2, %4 : vector<8x128xf32>
    %6 = math.tanh %5 : vector<8x128xf32>
    %c0_5 = arith.constant 0 : index
    %c0_6 = arith.constant 0 : index
    %7 = vector.load %arg5[%c0_5, %c0_6] : memref<128x128xf32, #tpu.memory_space<vmem>>, vector<128x128xf32>
    %cst_7 = arith.constant dense<0.000000e+00> : vector<8x128xf32>
    %8 = tpu.matmul %6, %7, %cst_7 {dimension_numbers = #tpu.dot_dimension_numbers<[1], [0], [0], [1], [0, 0, 1, 1], [], []>} : vector<8x128xf32>, vector<128x128xf32>, vector<8x128xf32> -> vector<8x128xf32>
    %c0_i32 = arith.constant 0 : i32
    %9 = arith.cmpi eq, %arg1, %c0_i32 : i32
    %10 = arith.extui %9 : i1 to i32
    %11 = arith.sitofp %10 : i32 to f32
    %c0_8 = arith.constant 0 : index
    %c0_9 = arith.constant 0 : index
    %12 = vector.load %arg6[%c0_8, %c0_9] : memref<1x128xf32, #tpu.memory_space<vmem>>, vector<1x128xf32>
    %13 = vector.broadcast %11 : f32 to vector<1x128xf32>
    %14 = arith.mulf %13, %12 : vector<1x128xf32>
    %15 = vector.broadcast %14 : vector<1x128xf32> to vector<8x128xf32>
    %16 = arith.addf %8, %15 : vector<8x128xf32>
    %c0_10 = arith.constant 0 : index
    %c0_11 = arith.constant 0 : index
    %c0_12 = arith.constant 0 : index
    %17 = vector.load %arg7[%c0_10, %c0_11, %c0_12] : memref<1x8x128xf32, #tpu.memory_space<vmem>>, vector<1x8x128xf32>
    %18 = vector.shape_cast %17 : vector<1x8x128xf32> to vector<8x128xf32>
    %19 = vector.shape_cast %16 : vector<8x128xf32> to vector<1x8x128xf32>
    tpu.vector_store %arg7[%c0_10, %c0_11, %c0_12], %19 {strides = array<i32>} : memref<1x8x128xf32, #tpu.memory_space<vmem>>, vector<1x8x128xf32>,
    return
  }
  func.func @transform_0(%arg0: i32, %arg1: i32) -> (i32, i32) {
    %c0_i32 = arith.constant 0 : i32
    %c0_i32_0 = arith.constant 0 : i32
    return %arg0, %c0_i32 : i32, i32
  }
  func.func @transform_1(%arg0: i32, %arg1: i32) -> (i32, i32) {
    %c0_i32 = arith.constant 0 : i32
    %c0_i32_0 = arith.constant 0 : i32
    return %c0_i32, %arg1 : i32, i32
  }
  func.func @transform_2(%arg0: i32, %arg1: i32) -> (i32, i32) {
    %c0_i32 = arith.constant 0 : i32
    %c0_i32_0 = arith.constant 0 : i32
    return %c0_i32, %arg1 : i32, i32
  }
  func.func @transform_3(%arg0: i32, %arg1: i32) -> (i32, i32) {
    %c0_i32 = arith.constant 0 : i32
    %c0_i32_0 = arith.constant 0 : i32
    return %arg1, %c0_i32 : i32, i32
  }
  func.func @transform_4(%arg0: i32, %arg1: i32) -> (i32, i32) {
    %c0_i32 = arith.constant 0 : i32
    %c0_i32_0 = arith.constant 0 : i32
    %c0_i32_1 = arith.constant 0 : i32
    return %c0_i32, %c0_i32_0 : i32, i32
  }
  func.func @transform_5(%arg0: i32, %arg1: i32) -> (i32, i32, i32) {
    %c0_i32 = arith.constant 0 : i32
    %c0_i32_0 = arith.constant 0 : i32
    return %arg1, %arg0, %c0_i32 : i32, i32, i32
  }
}

</mosaic_0001>

<bundles_post_ra>
// kernel: tpu_custom_call.1
= control target key start
LH: loop header
LB: loop body
LE: loop exit
PB: predicated region body
PF: predicated region fallthrough
CT: control target
= control target key end

     0   :  { %10 = vsyncpa [#allocation3], 0  ;;  %s644_s0 = inlined_call_operand.hbm [shape: f32[8,128], index: 0, kind: input, shape index: {}]   ;;  %s645_s1 = inlined_call_operand.hbm [shape: f32[128,128], index: 1, kind: input, shape index: {}]   ;;  %s646_s2 = inlined_call_operand.vmem [shape: f32[1,128], index: 2, kind: input, shape index: {}]   ;;  %s647_s3 = inlined_call_operand.hbm [shape: f32[128,128], index: 3, kind: input, shape index: {}]   ;;  %s648_s4 = inlined_call_operand.vmem [shape: f32[1,128], index: 4, kind: input, shape index: {}]   ;;  %s649_s5 = inlined_call_operand.hbm [shape: f32[1,8,128], index: 5, kind: output, shape index: {}]  }
   0x1   :  { %11 = vsyncpa [#allocation6], 0 }
   0x2   :  { %12 = vsyncpa [#allocation4], 0  ;;  %s529_s18 = smov [#allocation5]   ;;  %s435_s22 = scalar_lea.hbm %s645_s1, 2048 }
   0x3   :  { %s28_s19 = sshll.u32 %s529_s18, 4  ;;  %p436_p0 = scmp.ne.s32.totalorder %s645_s1, %s435_s22  ;;  %s29_s19 = int_to_ptr.vmem [resolvable:$true] %s28_s19 }
   0x4   :  { %p439_p1 = scmp.lt.u32.totalorder %s435_s22, %s645_s1 }
   0x6   :  { %p441_p2 = pnand %p439_p1, %p436_p0 }
   0x8   :  { %444 = shalt.err (!%p441_p2)
}
   0x9   :  { %s445_s27 = scalar_lea.vmem %s29_s19, 2048  ;;  %p450_p4 = scmp.lt.s32.totalorder %s29_s19, %s29_s19 }
   0xa   :  { %p446_p3 = scmp.ne.s32.totalorder %s29_s19, %s445_s27  ;;  %p451_p5 = scmp.lt.s32.totalorder %s445_s27, %s445_s27 }
   0xc   :  { %p452_p6 = por %p451_p5, %p450_p4 }
   0xe   :  { %p453_p7 = pnand %p452_p6, %p446_p3 }
  0x10   :  { %456 = shalt.err (!%p453_p7)
}
  0x11   :  { %s530_s28 = smov 128   ;;  %s531_s29 = smov 8  }
  0x12   :  { %34 = dma.hbm_to_vmem [thread:$0]  %s645_s1, 2048, %s29_s19, [#allocation6], %s530_s28, %s530_s28, %s531_s29  }
  0x13   :  { %s532_s7 = smov [#allocation2]   ;;  %s533_s9 = smov [#allocation7]  }
  0x14   :  { %s19_s8 = sshll.u32 %s532_s7, 4  ;;  %s42_s10 = sshll.u32 %s533_s9, 4  ;;  %s20_s8 = int_to_ptr.vmem [resolvable:$true] %s19_s8  ;;  %s43_s10 = int_to_ptr.vmem [resolvable:$true] %s42_s10 }
  0x15   :  { %s457_s13 = scalar_lea.hbm %s644_s0, 128 }
  0x16   :  { %p458_p8 = scmp.ne.s32.totalorder %s644_s0, %s457_s13  ;;  %p461_p9 = scmp.lt.u32.totalorder %s457_s13, %s644_s0 }
  0x18   :  { %p463_p10 = pnand %p461_p9, %p458_p8 }
  0x1a   :  { %466 = shalt.err (!%p463_p10)
}
  0x1b   :  { %s467_s1 = scalar_lea.vmem %s20_s8, 128  ;;  %p472_p12 = scmp.lt.s32.totalorder %s20_s8, %s20_s8 }
  0x1c   :  { %p468_p11 = scmp.ne.s32.totalorder %s20_s8, %s467_s1  ;;  %p473_p13 = scmp.lt.s32.totalorder %s467_s1, %s467_s1 }
  0x1e   :  { %p474_p0 = por %p473_p13, %p472_p12 }
  0x20   :  { %p475_p1 = pnand %p474_p0, %p468_p11 }
  0x22   :  { %478 = shalt.err (!%p475_p1)
}
  0x23   :  { %22 = dma.hbm_to_vmem [thread:$0]  %s644_s0, 128, %s20_s8, [#allocation3]  }
  0x24   :  { %s479_s22 = scalar_lea.hbm %s647_s3, 2048 }
  0x25   :  { %p480_p2 = scmp.ne.s32.totalorder %s647_s3, %s479_s22  ;;  %p483_p3 = scmp.lt.u32.totalorder %s479_s22, %s647_s3 }
  0x27   :  { %p485_p4 = pnand %p483_p3, %p480_p2 }
  0x29   :  { %488 = shalt.err (!%p485_p4)
}
  0x2a   :  { %s489_s27 = scalar_lea.vmem %s43_s10, 2048  ;;  %p494_p6 = scmp.lt.s32.totalorder %s43_s10, %s43_s10 }
  0x2b   :  { %p490_p5 = scmp.ne.s32.totalorder %s43_s10, %s489_s27  ;;  %p495_p7 = scmp.lt.s32.totalorder %s489_s27, %s489_s27 }
  0x2d   :  { %p496_p8 = por %p495_p7, %p494_p6 }
  0x2f   :  { %p497_p9 = pnand %p496_p8, %p490_p5 }
  0x31   :  { %500 = shalt.err (!%p497_p9)
}
  0x32   :  { %48 = dma.hbm_to_vmem [thread:$0]  %s647_s3, 2048, %s43_s10, [#allocation6], %s530_s28, %s530_s28, %s531_s29  }
  0x33   :  { %523 = dma.done.wait [#allocation3], 128  }
  0x34   :  { %524 = vsyncadd [#allocation3], 4294967168 }
  0x35   :  { %525 = dma.done.wait [#allocation6], 4096  }
  0x36   :  { %526 = vsyncadd [#allocation6], 4294963200  ;;  %v534_v0 = vmov 0.0|0.0   ;;  %vm535_vm0 = vmmov 0   ;;  %v536_v1 = vmov 0.0   ;;  %v61_v2 = vld [vmem:[#allocation5] sm:$0xff] }
  0x37   :  { %376 = vmatprep.subr.bf16.mxu0 %v534_v0  ;;  %338 = vmatprep.mubr.msk.f32.mxu0 %vm535_vm0, %v536_v1  ;;  %v62_v3 = vld [vmem:[#allocation5 + $0x8] sm:$0xff]  ;;  %v63_v4 = vld [vmem:[#allocation5 + $0x10] sm:$0xff]  ;;  %v64_v6 = vld [vmem:[#allocation5 + $0x18] sm:$0xff]  ;;  %s537_s7 = smov [#allocation8]  }
  0x38   :  { %400 = vmatprep.subr.bf16.mxu1 %v534_v0  ;;  %373 = vmatprep.mubr.msk.f32.mxu1 %vm535_vm0, %v536_v1  ;;  %v377_v5 = vpack.c.bf16 %v62_v3, %v61_v2  ;;  %v380_v7 = vpack.c.bf16 %v64_v6, %v63_v4  ;;  %v65_v8 = vld [vmem:[#allocation5 + $0x20] sm:$0xff]  ;;  %v66_v9 = vld [vmem:[#allocation5 + $0x28] sm:$0xff]  ;;  %v157_v12 = vld [vmem:[#allocation7 + $0x10] sm:$0xff]  ;;  %s260_s8 = sshll.u32 %s537_s7, 4  ;;  %s261_s8 = int_to_ptr.vmem [resolvable:$true] %s260_s8 }
  0x39   :  { %v155_v10 = vld [vmem:[#allocation7] sm:$0xff]  ;;  %v156_v11 = vld [vmem:[#allocation7 + $0x8] sm:$0xff]  ;;  %v158_v13 = vld [vmem:[#allocation7 + $0x18] sm:$0xff]  ;;  %v383_v14 = vpack.c.bf16 %v66_v9, %v65_v8  ;;  %s501_s9 = scalar_lea.vmem %s261_s8, 128  ;;  %p506_p11 = scmp.lt.s32.totalorder %s261_s8, %s261_s8 }
  0x3a   :  { %378 = vmatpush3.bf16.msra.mxu0 %v377_v5  ;;  %v401_v15 = vpack.c.bf16 %v156_v11, %v155_v10  ;;  %v67_v16 = vld [vmem:[#allocation5 + $0x30] sm:$0xff]  ;;  %v68_v17 = vld [vmem:[#allocation5 + $0x38] sm:$0xff]  ;;  %v404_v18 = vpack.c.bf16 %v158_v13, %v157_v12  ;;  %v159_v19 = vld [vmem:[#allocation7 + $0x20] sm:$0xff]  ;;  %p502_p10 = scmp.ne.s32.totalorder %s261_s8, %s501_s9  ;;  %p507_p12 = scmp.lt.s32.totalorder %s501_s9, %s501_s9 }
  0x3b   :  { %379 = vmatprep.subr.bf16.mxu0 %v534_v0  ;;  %v160_v20 = vld [vmem:[#allocation7 + $0x28] sm:$0xff]  ;;  %v386_v21 = vpack.c.bf16 %v68_v17, %v67_v16  ;;  %v69_v22 = vld [vmem:[#allocation5 + $0x40] sm:$0xff]  ;;  %v161_v25 = vld [vmem:[#allocation7 + $0x30] sm:$0xff] }
  0x3c   :  { %402 = vmatpush3.bf16.msra.mxu1 %v401_v15  ;;  %v70_v23 = vld [vmem:[#allocation5 + $0x48] sm:$0xff]  ;;  %v407_v24 = vpack.c.bf16 %v160_v20, %v159_v19  ;;  %v162_v26 = vld [vmem:[#allocation7 + $0x38] sm:$0xff]  ;;  %v71_v28 = vld [vmem:[#allocation5 + $0x50] sm:$0xff]  ;;  %p508_p13 = por %p507_p12, %p506_p11 }
  0x3d   :  { %403 = vmatprep.subr.bf16.mxu1 %v534_v0  ;;  %v389_v27 = vpack.c.bf16 %v70_v23, %v69_v22  ;;  %v72_v29 = vld [vmem:[#allocation5 + $0x58] sm:$0xff]  ;;  %v410_v30 = vpack.c.bf16 %v162_v26, %v161_v25  ;;  %v163_v31 = vld [vmem:[#allocation7 + $0x40] sm:$0xff]  ;;  %v164_v32 = vld [vmem:[#allocation7 + $0x48] sm:$0xff] }
  0x3e   :  { %381 = vmatpush3.bf16.msra.mxu0 %v380_v7  ;;  %v392_v33 = vpack.c.bf16 %v72_v29, %v71_v28  ;;  %v73_v34 = vld [vmem:[#allocation5 + $0x60] sm:$0xff]  ;;  %v74_v35 = vld [vmem:[#allocation5 + $0x68] sm:$0xff]  ;;  %v413_v36 = vpack.c.bf16 %v164_v32, %v163_v31  ;;  %v75_v38 = vld [vmem:[#allocation5 + $0x70] sm:$0xff]  ;;  %p509_p0 = pnand %p508_p13, %p502_p10 }
  0x3f   :  { %382 = vmatprep.subr.bf16.mxu0 %v534_v0  ;;  %v395_v37 = vpack.c.bf16 %v74_v35, %v73_v34  ;;  %v76_v39 = vld [vmem:[#allocation5 + $0x78] sm:$0xff]  ;;  %v165_v42 = vld [vmem:[#allocation7 + $0x50] sm:$0xff]  ;;  %v167_v45 = vld [vmem:[#allocation7 + $0x60] sm:$0xff] }
  0x40   :  { %405 = vmatpush3.bf16.msra.mxu1 %v404_v18  ;;  %v398_v40 = vpack.c.bf16 %v76_v39, %v75_v38  ;;  %v60_v41 = vld [vmem:[#allocation2] sm:$0xff]  ;;  %v168_v46 = vld [vmem:[#allocation7 + $0x68] sm:$0xff]  ;;  %v169_v48 = vld [vmem:[#allocation7 + $0x70] sm:$0xff] }
  0x41   :  { %406 = vmatprep.subr.bf16.mxu1 %v534_v0  ;;  %v166_v43 = vld [vmem:[#allocation7 + $0x58] sm:$0xff]  ;;  %v419_v47 = vpack.c.bf16 %v168_v46, %v167_v45 }
  0x42   :  { %384 = vmatpush3.bf16.msra.mxu0 %v383_v14  ;;  %v416_v44 = vpack.c.bf16 %v166_v43, %v165_v42  ;;  %v170_v49 = vld [vmem:[#allocation7 + $0x78] sm:$0xff] }
  0x43   :  { %385 = vmatprep.subr.bf16.mxu0 %v534_v0  ;;  %v422_v50 = vpack.c.bf16 %v170_v49, %v169_v48  ;;  %v270_v51 = vld [vmem:[%s646_s2] ss:$0 sm:$0xff] }
  0x44   :  { %408 = vmatpush3.bf16.msra.mxu1 %v407_v24  ;;  %v271_v56 = vld [vmem:[%s648_s4] ss:$0 sm:$0xff] }
  0x45   :  { %409 = vmatprep.subr.bf16.mxu1 %v534_v0 }
  0x46   :  { %387 = vmatpush3.bf16.msra.mxu0 %v386_v21 }
  0x47   :  { %388 = vmatprep.subr.bf16.mxu0 %v534_v0 }
  0x48   :  { %411 = vmatpush3.bf16.msra.mxu1 %v410_v30 }
  0x49   :  { %412 = vmatprep.subr.bf16.mxu1 %v534_v0 }
  0x4a   :  { %390 = vmatpush3.bf16.msra.mxu0 %v389_v27 }
  0x4b   :  { %391 = vmatprep.subr.bf16.mxu0 %v534_v0 }
  0x4c   :  { %414 = vmatpush3.bf16.msra.mxu1 %v413_v36 }
  0x4d   :  { %415 = vmatprep.subr.bf16.mxu1 %v534_v0 }
  0x4e   :  { %393 = vmatpush3.bf16.msra.mxu0 %v392_v33 }
  0x4f   :  { %394 = vmatprep.subr.bf16.mxu0 %v534_v0 }
  0x50   :  { %417 = vmatpush3.bf16.msra.mxu1 %v416_v44 }
  0x51   :  { %418 = vmatprep.subr.bf16.mxu1 %v534_v0 }
  0x52   :  { %396 = vmatpush3.bf16.msra.mxu0 %v395_v37 }
  0x53   :  { %397 = vmatprep.subr.bf16.mxu0 %v534_v0 }
  0x54   :  { %420 = vmatpush3.bf16.msra.mxu1 %v419_v47 }
  0x55   :  { %421 = vmatprep.subr.bf16.mxu1 %v534_v0 }
  0x56   :  { %399 = vmatpush3.bf16.msra.mxu0 %v398_v40 }
  0x58   :  { %423 = vmatpush3.bf16.msra.mxu1 %v422_v50 }
  0x59   :  { %339 = vmatmul.mubr.f32.vlgmr.msra.gmra.mrb[0].mxu0 %v60_v41 }
 0x12c   :  { %v150_v52 = vpop.f32.mrb[0].mxu0 }
 0x12d   :  { %v151_v53 = vadd.f32 %v270_v51, %v150_v52  ;;  %v340_v54 = vpop.f32.mrb[1].mxu0 }
 0x12f   :  { %433 = vtanh.f32 %v151_v53 }
 0x139   :  { %v434_v55 = vpop.eup %433 }
 0x13a   :  { %374 = vmatmul.mubr.f32.vlgmr.msra.gmra.mrb[0].mxu1 %v434_v55 }
 0x20d   :  { %v249_v57 = vpop.f32.mrb[0].mxu1 }
 0x20e   :  { %v250_v58 = vadd.f32 %v271_v56, %v249_v57  ;;  %v375_v59 = vpop.f32.mrb[1].mxu1 }
 0x210   :  { %253 = vst [vmem:[#allocation8] sm:$0xff] %v250_v58 }
 0x211   :  { %512 = shalt.err (!%p509_p0)
}
 0x212   :  { %s513_s11 = scalar_lea.hbm %s649_s5, 128 }
 0x213   :  { %p514_p1 = scmp.ne.s32.totalorder %s649_s5, %s513_s11  ;;  %p517_p2 = scmp.lt.u32.totalorder %s513_s11, %s649_s5 }
 0x215   :  { %p519_p3 = pnand %p517_p2, %p514_p1 }
 0x217   :  { %522 = shalt.err (!%p519_p3)
}
 0x218   :  { %263 = dma.vmem_to_hbm [thread:$0]  %s261_s8, 128, %s649_s5, [#allocation4]  }
 0x219   :  { %527 = dma.done.wait [#allocation4], 128  }
 0x21a   :  { %528 = vsyncadd [#allocation4], 4294967168 }
 0x21b   :  { %267 = vsyncpa [#allocation3], 1 }
 0x21c   :  { %268 = vsyncpa [#allocation6], 1 }
 0x21d   :  { %269 = vsyncpa [#allocation4], 1 }

</bundles_post_ra>
